<compile_context>
chip_gen: v6e
topology: v6e:2x2x1
jax: 0.10.0
libtpu: 0.0.40
codegen_flags: <defaults>
</compile_context>

<pallas_src>
import functools

import jax
import jax.numpy as jnp
from jax.experimental import pallas as pl
from jax.experimental.pallas import tpu as pltpu


SCALE = 33.3333333333   # MoCoMarginsLossConfig.scale
MARGIN = 0.0            # 0.0 -> NT-Xent (default loss). >0 -> CosFace additive margin.

_LANES = 128
_NEG_INF = -1e30        # finite "-inf": avoids any inf-inf NaN risk in the online LSE


def _moco_ntxent_kernel(pos_ref, q_ref, queue_ref, out_ref, m_sc, s_sc, *, k_tile):
    """One (n_tile, k_tile) grid step of the online-logsumexp NT-Xent loss.

    pos_ref:   (TN, 1)    f32       scale * (pos - margin), resident across K
    q_ref:     (TN, C)    mm dtype  scale * query, resident across K
    queue_ref: (C, TK)    mm dtype  pipelined along K
    out_ref:   (TN, 1)    f32       per-row loss, written at the last K step
    m_sc:      (TN, 128)  f32       per-lane running max of scaled negatives
    s_sc:      (TN, 128)  f32       per-lane running sum of exp(neg - m)
    """
    k_step = pl.program_id(1)
    groups = k_tile // _LANES

    @pl.when(k_step == 0)
    def _init():
        m_sc[...] = jnp.full(m_sc.shape, _NEG_INF, dtype=jnp.float32)
        s_sc[...] = jnp.zeros(s_sc.shape, dtype=jnp.float32)

    # Scaled negative logits for this K tile (scale was folded into q in the
    # wrapper, so no per-step multiply over the (TN, TK) tile is needed).
    neg = jnp.dot(q_ref[...], queue_ref[...],
                  preferred_element_type=jnp.float32)                # (TN, TK) f32

    # Per-lane online logsumexp: lane-aligned 128-column slices are combined
    # with pure VPU max/add; no cross-lane (XLU) reduce on the per-step path.
    m_prev = m_sc[...]
    tile_max = neg[:, 0:_LANES]
    for g in range(1, groups):
        tile_max = jnp.maximum(tile_max, neg[:, g * _LANES:(g + 1) * _LANES])
    m_new = jnp.maximum(m_prev, tile_max)                            # (TN, 128)

    s_new = s_sc[...] * jnp.exp(m_prev - m_new)
    for g in range(groups):
        s_new = s_new + jnp.exp(neg[:, g * _LANES:(g + 1) * _LANES] - m_new)

    m_sc[...] = m_new
    s_sc[...] = s_new

    @pl.when(k_step == pl.num_programs(1) - 1)
    def _finalize():
        m_lane = m_sc[...]                                           # (TN, 128)
        s_lane = s_sc[...]
        # Single cross-lane reduce, done once per (n, :) tile.
        m_row = jnp.max(m_lane, axis=1, keepdims=True)               # (TN, 1)
        s_row = jnp.sum(s_lane * jnp.exp(m_lane - m_row), axis=1, keepdims=True)
        # Merge the (already scaled, margin-applied) positive logit.
        p = pos_ref[...]                                             # (TN, 1)
        m_all = jnp.maximum(m_row, p)
        s_all = s_row * jnp.exp(m_row - m_all) + jnp.exp(p - m_all)
        # Cross-entropy with label 0: lse(logits) - logits[:, 0].
        out_ref[...] = m_all + jnp.log(s_all) - p


def _pick_divisor(dim, candidates):
    for c in candidates:
        if c <= dim and dim % c == 0:
            return c
    return dim


def moco_margins_loss(query, key, queue, *, scale=SCALE, margin=MARGIN,
                      matmul_dtype=jnp.bfloat16, n_tile=None, k_tile=None,
                      vmem_budget_bytes=24 * 1024 * 1024):
    """Pallas wrapper. query: (N, C), key: (N, C), queue: (C, K) -> scalar loss."""
    N, C = query.shape
    Cq, K = queue.shape
    assert C == Cq, "query/queue embedding dims must match"
    assert K % _LANES == 0, "queue size K must be a multiple of 128"

    mm_bytes = jnp.dtype(matmul_dtype).itemsize

    if n_tile is None:
        n_tile = _pick_divisor(N, (512, 256, 128, 64, 32, 16, 8))
    if k_tile is None:
        k_tile = _LANES
        for cand in (8192, 4096, 2048, 1024, 512, 256, 128):
            if K % cand:
                continue
            footprint = (2 * C * cand * mm_bytes        # double-buffered queue tile
                         + n_tile * cand * 4            # f32 neg tile
                         + 2 * n_tile * C * mm_bytes    # resident q block (x2 buffers)
                         + 2 * n_tile * _LANES * 4)     # m/s scratch
            if footprint <= vmem_budget_bytes:
                k_tile = cand
                break
    assert N % n_tile == 0, f"n_tile={n_tile} must divide N={N}"
    assert K % k_tile == 0 and k_tile % _LANES == 0, \
        f"k_tile={k_tile} must divide K={K} and be a multiple of 128"

    # Positive logit (tiny N*C work) in the wrapper; scale folded into q once.
    q32 = query.astype(jnp.float32)
    k32 = key.astype(jnp.float32)
    pos_scaled = scale * (jnp.sum(q32 * k32, axis=1, keepdims=True) - margin)  # (N, 1)
    q_mm = (scale * q32).astype(matmul_dtype)
    # In MoCo training the queue should be *stored* in matmul_dtype (bf16) so
    # this cast is a no-op and the kernel streams half the HBM bytes.
    queue_mm = queue.astype(matmul_dtype)

    kernel = functools.partial(_moco_ntxent_kernel, k_tile=k_tile)

    per_row_loss = pl.pallas_call(
        kernel,
        out_shape=jax.ShapeDtypeStruct((N, 1), jnp.float32),
        grid_spec=pltpu.PrefetchScalarGridSpec(
            num_scalar_prefetch=0,
            grid=(N // n_tile, K // k_tile),
            in_specs=[
                # pos and q stay resident across the K reduction axis.
                pl.BlockSpec((n_tile, 1), lambda n, k: (n, 0)),
                pl.BlockSpec((n_tile, C), lambda n, k: (n, 0)),
                # queue is pipelined along K.
                pl.BlockSpec((C, k_tile), lambda n, k: (0, k)),
            ],
            out_specs=pl.BlockSpec((n_tile, 1), lambda n, k: (n, 0)),
            scratch_shapes=[
                pltpu.VMEM((n_tile, _LANES), jnp.float32),   # per-lane running max
                pltpu.VMEM((n_tile, _LANES), jnp.float32),   # per-lane running sum_exp
            ],
        ),
        compiler_params=pltpu.CompilerParams(
            dimension_semantics=("parallel", "arbitrary"),
            vmem_limit_bytes=40 * 1024 * 1024),
    )(pos_scaled, q_mm, queue_mm)

    return jnp.mean(per_row_loss)


def moco_margins_loss_ref(query, key, queue, *, scale=SCALE, margin=MARGIN):
    """Pure-JAX f32 reference mirroring the PyTorch forward."""
    q = query.astype(jnp.float32)
    k = key.astype(jnp.float32)
    qu = queue.astype(jnp.float32)
    pos = jnp.einsum('nc,nc->n', q, k)[:, None] - margin
    neg = jnp.einsum('nc,ck->nk', q, qu)
    logits = scale * jnp.concatenate([pos, neg], axis=1)
    lse = jax.scipy.special.logsumexp(logits, axis=1)
    return jnp.mean(lse - logits[:, 0])


if __name__ == "__main__":
    # Small MoCo-like shapes: batch N=8, embedding dim C=128, queue size K=512.
    N, C, K = 8, 128, 512
    rng = jax.random.PRNGKey(0)
    kq, kk, kqueue = jax.random.split(rng, 3)

    # L2-normalized embeddings, as MoCo provides to this loss.
    query = jax.random.normal(kq, (N, C), dtype=jnp.float32)
    query = query / jnp.linalg.norm(query, axis=1, keepdims=True)
    key = jax.random.normal(kk, (N, C), dtype=jnp.float32)
    key = key / jnp.linalg.norm(key, axis=1, keepdims=True)
    queue = jax.random.normal(kqueue, (C, K), dtype=jnp.float32)
    queue = queue / jnp.linalg.norm(queue, axis=0, keepdims=True)

    ref = jax.block_until_ready(moco_margins_loss_ref(query, key, queue))

    # 1) f32 MXU path with k_tile=128 (4 K steps) to exercise the online-LSE
    #    reduction and finalize merge; tight tolerance vs the f32 reference.
    loss_f32 = jax.block_until_ready(
        moco_margins_loss(query, key, queue, matmul_dtype=jnp.float32, k_tile=128))
    assert jnp.allclose(loss_f32, ref, rtol=1e-4, atol=1e-4), (loss_f32, ref)

    # 2) Default bf16-streaming path (half the HBM bytes, native MXU dtype);
    #    tolerance relaxed for the bf16 cast of (scale*q) and queue.
    loss_bf16 = jax.block_until_ready(
        moco_margins_loss(query, key, queue, k_tile=128))
    assert jnp.allclose(loss_bf16, ref, rtol=2e-2, atol=2e-2), (loss_bf16, ref)

    # 3) CosFace variant (additive margin on the positive), default tiling.
    ref_m = jax.block_until_ready(
        moco_margins_loss_ref(query, key, queue, margin=0.1))
    loss_m = jax.block_until_ready(
        moco_margins_loss(query, key, queue, margin=0.1, matmul_dtype=jnp.float32))
    assert jnp.allclose(loss_m, ref_m, rtol=1e-4, atol=1e-4), (loss_m, ref_m)

    print("KERNEL_OK")
</pallas_src>

<mosaic_0001>
module attributes {stable_mosaic.version = 11 : i64} {
  func.func @_moco_ntxent_kernel(%arg0: i32, %arg1: i32, %arg2: memref<8x1xf32, #tpu.memory_space<vmem>>, %arg3: memref<8x128xf32, #tpu.memory_space<vmem>>, %arg4: memref<128x128xf32, #tpu.memory_space<vmem>>, %arg5: memref<8x1xf32, #tpu.memory_space<vmem>>, %arg6: memref<8x128xf32, #tpu.memory_space<vmem>>, %arg7: memref<8x128xf32, #tpu.memory_space<vmem>>) attributes {dimension_semantics = [#tpu.dimension_semantics<parallel>, #tpu.dimension_semantics<arbitrary>], iteration_bounds = array<i64: 1, 4>, scalar_prefetch = 0 : i64, scratch_operands = 2 : i64, tpu.core_type = #tpu.core_type<tc>, window_params = [{transform_indices = @transform_0, window_bounds = array<i64: 8, 1>}, {transform_indices = @transform_1, window_bounds = array<i64: 8, 128>}, {transform_indices = @transform_2, window_bounds = array<i64: 128, 128>}, {transform_indices = @transform_3, window_bounds = array<i64: 8, 1>}]} {
    %c0_i32 = arith.constant 0 : i32
    %0 = arith.cmpi eq, %arg1, %c0_i32 : i32
    %1 = arith.extui %0 : i1 to i32
    %c0_i32_0 = arith.constant 0 : i32
    %2 = arith.cmpi ne, %1, %c0_i32_0 : i32
    scf.if %2 {
      %cst_13 = arith.constant -1.000000e+30 : f32
      %20 = vector.broadcast %cst_13 : f32 to vector<8x128xf32>
      %c0_14 = arith.constant 0 : index
      %c0_15 = arith.constant 0 : index
      %21 = vector.load %arg6[%c0_14, %c0_15] : memref<8x128xf32, #tpu.memory_space<vmem>>, vector<8x128xf32>
      tpu.vector_store %arg6[%c0_14, %c0_15], %20 {strides = array<i32>} : memref<8x128xf32, #tpu.memory_space<vmem>>, vector<8x128xf32>,
      %cst_16 = arith.constant 0.000000e+00 : f32
      %22 = vector.broadcast %cst_16 : f32 to vector<8x128xf32>
      %c0_17 = arith.constant 0 : index
      %c0_18 = arith.constant 0 : index
      %23 = vector.load %arg7[%c0_17, %c0_18] : memref<8x128xf32, #tpu.memory_space<vmem>>, vector<8x128xf32>
      tpu.vector_store %arg7[%c0_17, %c0_18], %22 {strides = array<i32>} : memref<8x128xf32, #tpu.memory_space<vmem>>, vector<8x128xf32>,
    } else {
    }
    %c0 = arith.constant 0 : index
    %c0_1 = arith.constant 0 : index
    %3 = vector.load %arg3[%c0, %c0_1] : memref<8x128xf32, #tpu.memory_space<vmem>>, vector<8x128xf32>
    %c0_2 = arith.constant 0 : index
    %c0_3 = arith.constant 0 : index
    %4 = vector.load %arg4[%c0_2, %c0_3] : memref<128x128xf32, #tpu.memory_space<vmem>>, vector<128x128xf32>
    %cst = arith.constant dense<0.000000e+00> : vector<8x128xf32>
    %5 = tpu.matmul %3, %4, %cst {dimension_numbers = #tpu.dot_dimension_numbers<[1], [0], [0], [1], [0, 0, 1, 1], [], []>} : vector<8x128xf32>, vector<128x128xf32>, vector<8x128xf32> -> vector<8x128xf32>
    %c0_4 = arith.constant 0 : index
    %c0_5 = arith.constant 0 : index
    %6 = vector.load %arg6[%c0_4, %c0_5] : memref<8x128xf32, #tpu.memory_space<vmem>>, vector<8x128xf32>
    %7 = arith.maximumf %6, %5 : vector<8x128xf32>
    %c0_6 = arith.constant 0 : index
    %c0_7 = arith.constant 0 : index
    %8 = vector.load %arg7[%c0_6, %c0_7] : memref<8x128xf32, #tpu.memory_space<vmem>>, vector<8x128xf32>
    %9 = arith.subf %6, %7 : vector<8x128xf32>
    %10 = math.exp %9 : vector<8x128xf32>
    %11 = arith.mulf %8, %10 : vector<8x128xf32>
    %12 = arith.subf %5, %7 : vector<8x128xf32>
    %13 = math.exp %12 : vector<8x128xf32>
    %14 = arith.addf %11, %13 : vector<8x128xf32>
    %c0_8 = arith.constant 0 : index
    %c0_9 = arith.constant 0 : index
    %15 = vector.load %arg6[%c0_8, %c0_9] : memref<8x128xf32, #tpu.memory_space<vmem>>, vector<8x128xf32>
    tpu.vector_store %arg6[%c0_8, %c0_9], %7 {strides = array<i32>} : memref<8x128xf32, #tpu.memory_space<vmem>>, vector<8x128xf32>,
    %c0_10 = arith.constant 0 : index
    %c0_11 = arith.constant 0 : index
    %16 = vector.load %arg7[%c0_10, %c0_11] : memref<8x128xf32, #tpu.memory_space<vmem>>, vector<8x128xf32>
    tpu.vector_store %arg7[%c0_10, %c0_11], %14 {strides = array<i32>} : memref<8x128xf32, #tpu.memory_space<vmem>>, vector<8x128xf32>,
    %c3_i32 = arith.constant 3 : i32
    %17 = arith.cmpi eq, %arg1, %c3_i32 : i32
    %18 = arith.extui %17 : i1 to i32
    %c0_i32_12 = arith.constant 0 : i32
    %19 = arith.cmpi ne, %18, %c0_i32_12 : i32
    scf.if %19 {
      %c0_13 = arith.constant 0 : index
      %c0_14 = arith.constant 0 : index
      %20 = vector.load %arg6[%c0_13, %c0_14] : memref<8x128xf32, #tpu.memory_space<vmem>>, vector<8x128xf32>
      %c0_15 = arith.constant 0 : index
      %c0_16 = arith.constant 0 : index
      %21 = vector.load %arg7[%c0_15, %c0_16] : memref<8x128xf32, #tpu.memory_space<vmem>>, vector<8x128xf32>
      %cst_17 = arith.constant dense<0xFF800000> : vector<8xf32>
      %22 = vector.multi_reduction <maximumf>, %20, %cst_17 [1] : vector<8x128xf32> to vector<8xf32>
      %23 = vector.shape_cast %22 : vector<8xf32> to vector<8x1xf32>
      %24 = vector.broadcast %23 : vector<8x1xf32> to vector<8x128xf32>
      %25 = arith.subf %20, %24 : vector<8x128xf32>
      %26 = math.exp %25 : vector<8x128xf32>
      %27 = arith.mulf %21, %26 : vector<8x128xf32>
      %cst_18 = arith.constant dense<0.000000e+00> : vector<8xf32>
      %28 = vector.multi_reduction <add>, %27, %cst_18 [1] : vector<8x128xf32> to vector<8xf32>
      %29 = vector.shape_cast %28 : vector<8xf32> to vector<8x1xf32>
      %c0_19 = arith.constant 0 : index
      %c0_20 = arith.constant 0 : index
      %30 = vector.load %arg2[%c0_19, %c0_20] : memref<8x1xf32, #tpu.memory_space<vmem>>, vector<8x1xf32>
      %31 = arith.maximumf %23, %30 : vector<8x1xf32>
      %32 = arith.subf %23, %31 : vector<8x1xf32>
      %33 = math.exp %32 : vector<8x1xf32>
      %34 = arith.mulf %29, %33 : vector<8x1xf32>
      %35 = arith.subf %30, %31 : vector<8x1xf32>
      %36 = math.exp %35 : vector<8x1xf32>
      %37 = arith.addf %34, %36 : vector<8x1xf32>
      %38 = math.log %37 : vector<8x1xf32>
      %39 = arith.addf %31, %38 : vector<8x1xf32>
      %40 = arith.subf %39, %30 : vector<8x1xf32>
      %c0_21 = arith.constant 0 : index
      %c0_22 = arith.constant 0 : index
      %41 = vector.load %arg5[%c0_21, %c0_22] : memref<8x1xf32, #tpu.memory_space<vmem>>, vector<8x1xf32>
      tpu.vector_store %arg5[%c0_21, %c0_22], %40 {strides = array<i32>} : memref<8x1xf32, #tpu.memory_space<vmem>>, vector<8x1xf32>,
    } else {
    }
    return
  }
  func.func @transform_0(%arg0: i32, %arg1: i32) -> (i32, i32) {
    %c0_i32 = arith.constant 0 : i32
    %c0_i32_0 = arith.constant 0 : i32
    return %arg0, %c0_i32 : i32, i32
  }
  func.func @transform_1(%arg0: i32, %arg1: i32) -> (i32, i32) {
    %c0_i32 = arith.constant 0 : i32
    %c0_i32_0 = arith.constant 0 : i32
    return %arg0, %c0_i32 : i32, i32
  }
  func.func @transform_2(%arg0: i32, %arg1: i32) -> (i32, i32) {
    %c0_i32 = arith.constant 0 : i32
    %c0_i32_0 = arith.constant 0 : i32
    return %c0_i32, %arg1 : i32, i32
  }
  func.func @transform_3(%arg0: i32, %arg1: i32) -> (i32, i32) {
    %c0_i32 = arith.constant 0 : i32
    %c0_i32_0 = arith.constant 0 : i32
    return %arg0, %c0_i32 : i32, i32
  }
}

</mosaic_0001>

<bundles_post_ra>
// kernel: tpu_custom_call.1
= control target key start
LH: loop header
LB: loop body
LE: loop exit
PB: predicated region body
PF: predicated region fallthrough
CT: control target
= control target key end

     0   :  { %8 = vsyncpa [#allocation5], 0  ;;  %s840_s0 = inlined_call_operand.vmem [shape: f32[8,1], index: 0, kind: input, shape index: {}]   ;;  %s841_s1 = inlined_call_operand.vmem [shape: f32[8,128], index: 1, kind: input, shape index: {}]   ;;  %s842_s2 = inlined_call_operand.hbm [shape: f32[128,512], index: 2, kind: input, shape index: {}]   ;;  %s843_s3 = inlined_call_operand.vmem [shape: f32[8,1], index: 3, kind: output, shape index: {}]  }
   0x1   :  { %10 = vsyncpa [#allocation5 + $0x1], 0  ;;  %s718_s12 = smov 0   ;;  %s720_s13 = smov 0  }
   0x2   :  { %s722_s14 = smov 0   ;;  %s724_s15 = smov 0  }
   0x3   :  { %s726_s16 = smov 0   ;;  %s728_s17 = smov 0  }
   0x4 LB: > { %s470_s18 = sadd.s32 4294967295, %s688_s17   ;;  %s25_s19 = sadd.s32 1, %s684_s16  ;;  %s688_s17 = sphi %s728_s17, %s16_s17   ;;  %s684_s16 = sphi %s726_s16, %s851_s16   ;;  %s680_s15 = sphi %s724_s15, %s850_s15   ;;  %s676_s14 = sphi %s722_s14, %s849_s14   ;;  %s672_s13 = sphi %s720_s13, %s848_s13   ;;  %s668_s12 = sphi %s718_s12, %s847_s12  }
   0x5   : > { %p26_p0 = scmp.ge.s32.totalorder %s25_s19, 4  ;;  %s87_s20 = sadd.s32 1, %s676_s14 }
   0x6   : > { %p94_p1 = scmp.ne.s32.totalorder %s676_s14, %s672_s13  ;;  %p95_p2 = scmp.eq.s32.totalorder %s688_s17, 0 }
   0x7   : > { %s853_s19 = smov (%p26_p0, %s25_s19), 0  ;;  %p100_p4 = scmp.ne.s32.totalorder %s672_s13, %s668_s12 }
   0x8   : > { %p754_p3 = por %p95_p2, %p94_p1  ;;  %s84_s22 = ssub.s32 %s684_s16, %s853_s19 }
   0x9   : > { %p101_p5 = scmp.eq.s32.totalorder %s470_s18, 0  ;;  %p85_p6 = scmp.eq.s32.totalorder %s84_s22, 0 }
   0xa   : > { %p542_p8 = scmp.lt.s32.totalorder %s688_s17, 4  ;;  %s164_s25 = sand.u32 1, %s676_s14  }
   0xb   : > { %p761_p7 = por %p101_p5, %p100_p4  ;;  %s476_s26 = sshll.u32 %s684_s16, 7 }
   0xc   : > { %s767_s24 = scalar_select %p85_p6, %s676_s14, %s87_s20  }
   0xd   : > { %s475_s27 = sshll.u32 %s164_s25, 7  ;;  %s173_s30 = scalar_lea.hbm %s842_s2, %s476_s26 }
   0xe   : > { %s168_s4 = scalar_lea.vmem [#allocation4], %s475_s27  ;;  %p776_p9 = pnand %p542_p8, %p754_p3 }
   0xf   : > { %s174_s5 = sshll.u32 %s168_s4, 4  ;;  %p477_p10 = scmp.ge.s32.totalorder %s688_s17, 1  ;;  %s175_s5 = int_to_ptr.vmem [resolvable:$true] %s174_s5 }
  0x10   : > { %s165_s7 = scalar_lea.sflag [#allocation5], %s164_s25  ;;  %p612_p11 = pneg %p776_p9 }
  0x11   : > { %s623_s8 = scalar_lea.vmem %s175_s5, 2048  ;;  %s690_s9 = smov [#allocation4]  }
  0x12   : > { %p624_p12 = scmp.ne.s32.totalorder %s175_s5, %s623_s8  ;;  %s628_s10 = sshll.u32 %s690_s9, 4  ;;  %s629_s10 = int_to_ptr.vmem [resolvable:$false] %s628_s10 }
  0x13   : > { %s630_s11 = scalar_lea.vmem %s629_s10, 4096  ;;  %p631_p1 = scmp.lt.s32.totalorder %s175_s5, %s629_s10 }
  0x14   : > { %p626_p13 = pnand %p624_p12, %p612_p11  ;;  %p632_p2 = scmp.lt.s32.totalorder %s630_s11, %s623_s8 }
  0x16   : > { %p627_p0 = pneg %p626_p13  ;;  %p633_p3 = por %p632_p2, %p631_p1 }
  0x18   : > { %p634_p4 = pnand %p633_p3, %p627_p0 }
  0x1a   : > { %637 = shalt.err (!%p634_p4)
}
  0x1b   : > { %s691_s12 = smov 512   ;;  %s692_s18 = smov 128  }
  0x1c   : > { %s693_s20 = smov 8   ;;  %p182_p5 = scmp.lt.s32.totalorder %s688_s17, 5 }
  0x1d   : > { %541 = dma.hbm_to_vmem [thread:$0]  (!%p776_p9), %s173_s30, 2048, %s175_s5, %s165_s7, %s691_s12, %s692_s18, %s693_s20  }
  0x1e   : > { %p183_p6 = pnand %p477_p10, %p182_p5 }
  0x1f   : > { %s188_s21 = sand.u32 (!%p183_p6), 1, %s672_s13  }
  0x20   : > { %186 = sbr.rel (%p183_p6) target bundleno = 620 (0x26c), region = 32  ;;  %s478_s22 = sshll.u32 (!%p183_p6), %s188_s21, 7 }
  0x21   : > { %s189_s25 = scalar_lea.sflag (!%p183_p6), [#allocation5], %s188_s21  ;;  %s789_s26 = scalar_lea.vmem (!%p183_p6), [#allocation4], %s478_s22 }
  0x25   : > { %663 = dma.done.wait (%p761_p7), %s189_s25, 2048  }
  0x26   : > { %665 = vsyncadd (%p761_p7), %s189_s25, 4294965248  ;;  %p479_p8 = scmp.ne.s32.totalorder %s680_s15, 0 }
  0x28   : > { %237 = sbr.rel (%p479_p8) target bundleno = 47 (0x2f), region = 40 }
  0x2d   : > { %v694_v0 = vmov -1e+30   ;;  %v695_v1 = vmov 0.0  }
  0x2e   : > { %238 = vst [vmem:[#allocation2] sm:$0xff] %v694_v0  ;;  %239 = vst [vmem:[#allocation3] sm:$0xff] %v695_v1 }
  0x2f PF: > { %v256_v2 = vld [vmem:[%s789_s26 + $0x78] sm:$0xff]  ;;  %v696_v3 = vmov 0.0   ;;  %v255_v4 = vld [vmem:[%s789_s26 + $0x70] sm:$0xff]  ;;  %vm697_vm0 = vmmov 0   ;;  %v254_v5 = vld [vmem:[%s789_s26 + $0x68] sm:$0xff]  ;;  %p480_p7 = scmp.ne.s32.totalorder %s680_s15, 3 }
  0x30   : > { %501 = vmatprep.subr.mxu0 %v696_v3  ;;  %533 = vmatprep.mubr.msk.f32.mxu0 %vm697_vm0, %v696_v3  ;;  %v253_v6 = vld [vmem:[%s789_s26 + $0x60] sm:$0xff]  ;;  %v252_v7 = vld [vmem:[%s789_s26 + $0x58] sm:$0xff]  ;;  %v251_v8 = vld [vmem:[%s789_s26 + $0x50] sm:$0xff] }
  0x31   : > { %502 = vmatpush3.msra.mxu0 %v256_v2  ;;  %v250_v9 = vld [vmem:[%s789_s26 + $0x48] sm:$0xff]  ;;  %v249_v10 = vld [vmem:[%s789_s26 + $0x40] sm:$0xff]  ;;  %v248_v11 = vld [vmem:[%s789_s26 + $0x38] sm:$0xff] }
  0x32   : > { %503 = vmatprep.subr.mxu0 %v696_v3  ;;  %v247_v12 = vld [vmem:[%s789_s26 + $0x30] sm:$0xff]  ;;  %v246_v13 = vld [vmem:[%s789_s26 + $0x28] sm:$0xff]  ;;  %v245_v14 = vld [vmem:[%s789_s26 + $0x20] sm:$0xff] }
  0x33   : > { %504 = vmatpush3.msra.mxu0 %v255_v4  ;;  %v244_v15 = vld [vmem:[%s789_s26 + $0x18] sm:$0xff]  ;;  %v243_v16 = vld [vmem:[%s789_s26 + $0x10] sm:$0xff]  ;;  %v242_v17 = vld [vmem:[%s789_s26 + $0x8] sm:$0xff] }
  0x34   : > { %505 = vmatprep.subr.mxu0 %v696_v3  ;;  %v241_v18 = vld [vmem:[%s789_s26] sm:$0xff]  ;;  %v240_v19 = vld [vmem:[%s841_s1] sm:$0xff] }
  0x35   : > { %506 = vmatpush3.msra.mxu0 %v254_v5  ;;  %v327_v20 = vld [vmem:[#allocation2] sm:$0xff]  ;;  %v329_v28 = vld [vmem:[#allocation3] sm:$0xff] }
  0x36   : > { %507 = vmatprep.subr.mxu0 %v696_v3 }
  0x37   : > { %508 = vmatpush3.msra.mxu0 %v253_v6 }
  0x38   : > { %509 = vmatprep.subr.mxu0 %v696_v3 }
  0x39   : > { %510 = vmatpush3.msra.mxu0 %v252_v7 }
  0x3a   : > { %511 = vmatprep.subr.mxu0 %v696_v3 }
  0x3b   : > { %512 = vmatpush3.msra.mxu0 %v251_v8 }
  0x3c   : > { %513 = vmatprep.subr.mxu0 %v696_v3 }
  0x3d   : > { %514 = vmatpush3.msra.mxu0 %v250_v9 }
  0x3e   : > { %515 = vmatprep.subr.mxu0 %v696_v3 }
  0x3f   : > { %516 = vmatpush3.msra.mxu0 %v249_v10 }
  0x40   : > { %517 = vmatprep.subr.mxu0 %v696_v3 }
  0x41   : > { %518 = vmatpush3.msra.mxu0 %v248_v11 }
  0x42   : > { %519 = vmatprep.subr.mxu0 %v696_v3 }
  0x43   : > { %520 = vmatpush3.msra.mxu0 %v247_v12 }
  0x44   : > { %521 = vmatprep.subr.mxu0 %v696_v3 }
  0x45   : > { %522 = vmatpush3.msra.mxu0 %v246_v13 }
  0x46   : > { %523 = vmatprep.subr.mxu0 %v696_v3 }
  0x47   : > { %524 = vmatpush3.msra.mxu0 %v245_v14 }
  0x48   : > { %525 = vmatprep.subr.mxu0 %v696_v3 }
  0x49   : > { %526 = vmatpush3.msra.mxu0 %v244_v15 }
  0x4a   : > { %527 = vmatprep.subr.mxu0 %v696_v3 }
  0x4b   : > { %528 = vmatpush3.msra.mxu0 %v243_v16 }
  0x4c   : > { %529 = vmatprep.subr.mxu0 %v696_v3 }
  0x4d   : > { %530 = vmatpush3.msra.mxu0 %v242_v17 }
  0x4e   : > { %531 = vmatprep.subr.mxu0 %v696_v3 }
  0x4f   : > { %532 = vmatpush3.msra.mxu0 %v241_v18 }
  0x50   : > { %534 = vmatmul.mubr.f32.vlgmr.msra.gmra.mxu0 %v240_v19 }
 0x110   : > { %v323_v21 = vpop.f32.mrf.mxu0 }
 0x111   : > { %v328_v22 = vmax.f32 %v327_v20, %v323_v21 }
 0x112   : > { %v535_v23 = vpop.f32.mrf.mxu0 }
 0x113   : > { %v330_v24 = vsub.f32 %v327_v20, %v328_v22  ;;  %v334_v25 = vsub.f32 %v323_v21, %v328_v22  ;;  %338 = vst [vmem:[#allocation2] sm:$0xff] %v328_v22 }
 0x115   : > { %v331_v26 = vmul.f32 1.442695, %v330_v24  ;;  %v335_v27 = vmul.f32 1.442695, %v334_v25 }
 0x117   : > { %598 = vpow2.f32 %v331_v26 }
 0x118   : > { %600 = vpow2.f32 %v335_v27 }
 0x124   : > { %v599_v29 = vpop.eup %598 }
 0x125   : > { %v333_v30 = vmul.f32 %v599_v29, %v329_v28  ;;  %v601_v31 = vpop.eup %600  ;;  %343 = sbr.rel (%p480_p7) target bundleno = 620 (0x26c), region = 44 }
 0x127   : > { %v337_v32 = vadd.f32 %v601_v31, %v333_v30 }
 0x129   : > { %339 = vst [vmem:[#allocation3] sm:$0xff] %v337_v32 }
 0x12a   : > { %v344_v33 = vld [vmem:[#allocation2] sm:$0xff]  ;;  %vm368_vm1 = vcmask 7168  }
 0x12b   : > { %346 = vmax.xlane.f32.xlu0 %v344_v33  ;;  %v354_v40 = vld [vmem:[%s840_s0] sm:$0xff] }
 0x130   : > { %v345_v37 = vld [vmem:[#allocation3] sm:$0xff] }
 0x1b4   : > { %v347_v34 = vpop.xlane.xlu0 %346 }
 0x1b5   : > { %v348_v35 = vsub.f32 %v344_v33, %v347_v34  ;;  %v355_v41 = vmax.f32 %v347_v34, %v354_v40 }
 0x1b7   : > { %v349_v36 = vmul.f32 1.442695, %v348_v35  ;;  %v356_v42 = vsub.f32 %v347_v34, %v355_v41  ;;  %v360_v43 = vsub.f32 %v354_v40, %v355_v41 }
 0x1b9   : > { %602 = vpow2.f32 %v349_v36  ;;  %v357_v44 = vmul.f32 1.442695, %v356_v42  ;;  %v361_v45 = vmul.f32 1.442695, %v360_v43 }
 0x1bb   : > { %604 = vpow2.f32 %v357_v44 }
 0x1bc   : > { %606 = vpow2.f32 %v361_v45 }
 0x1c6   : > { %v603_v38 = vpop.eup %602 }
 0x1c7   : > { %v351_v39 = vmul.f32 %v603_v38, %v345_v37 }
 0x1c8   : > { %v605_v46 = vpop.eup %604 }
 0x1c9   : > { %352 = vadd.xlane.f32.xlu0 %v351_v39  ;;  %v607_v49 = vpop.eup %606 }
 0x252   : > { %v353_v47 = vpop.xlane.xlu0 %352 }
 0x253   : > { %v359_v48 = vmul.f32 %v605_v46, %v353_v47 }
 0x255   : > { %v363_v50 = vadd.f32 %v607_v49, %v359_v48 }
 0x257   : > { %608 = vlog2.f32 %v363_v50 }
 0x264   : > { %v609_v51 = vpop.eup %608 }
 0x265   : > { %v365_v52 = vmul.f32 0.6931472, %v609_v51 }
 0x267   : > { %v366_v53 = vadd.f32 %v365_v52, %v355_v41 }
 0x269   : > { %v367_v54 = vsub.f32 %v366_v53, %v354_v40 }
 0x26b   : > { %369 = vst.msk [vmem:[%s843_s3] sm:$0xff] %vm368_vm1, %v367_v54 }
 0x26c PF: > { %s16_s17 = sadd.s32 1, %s688_s17   ;;  %s847_s12 = smov %s672_s13 }
 0x26d   : > { %p13_p9 = scmp.ge.s32.totalorder %s16_s17, 6   ;;  %s848_s13 = smov %s676_s14 }
 0x26e   : > { %s849_s14 = smov %s767_s24  ;;  %s850_s15 = smov %s684_s16 }
 0x26f   : > { %s851_s16 = smov %s853_s19  ;;  %15 = sbr.rel (!%p13_p9) target bundleno = 4 (0x4), region = 86 }
 0x274   :  { %389 = vsyncpa [#allocation5], 1 }
 0x275   :  { %391 = vsyncpa [#allocation5 + $0x1], 1 }

</bundles_post_ra>
